<compile_context>
chip_gen: v7x
topology: tpu7x:2x2x1
jax: 0.10.0
libtpu: 0.0.40
codegen_flags: <defaults>
</compile_context>

<pallas_src>
import functools
import math

import jax
import jax.numpy as jnp
from jax.experimental import pallas as pl
from jax.experimental.pallas import tpu as pltpu


# ----------------------------------------------------------------------------
# Kernel 1: boundary mask on the natural (B, T) layout
#   is_vowel      = isin(ph, vowel_ids)
#   next_is_vowel = isin(ph at t+1, vowel_ids), forced False at t == T-1
#   mask          = (boundaries > 0.1) & is_vowel & next_is_vowel
# ----------------------------------------------------------------------------
def _mask_kernel(ph_ref, ph_next_ref, bnd_ref, vowel_ref, mask_ref, *, T):
    ph = ph_ref[...]            # (B, T) int32
    ph_next = ph_next_ref[...]  # (B, T) int32, time-rolled by -1 (wrap col killed below)
    n_vowels = vowel_ref.shape[0]

    is_v = jnp.zeros(ph.shape, dtype=jnp.bool_)
    next_v = jnp.zeros(ph.shape, dtype=jnp.bool_)
    for k in range(n_vowels):          # small static loop, scalar reads from SMEM
        vid = vowel_ref[k]
        is_v = jnp.logical_or(is_v, ph == vid)
        next_v = jnp.logical_or(next_v, ph_next == vid)

    # zero the last frame of every utterance (matches torch's zero pad of
    # next_is_vowel, independent of what the roll wrapped around)
    col = jax.lax.broadcasted_iota(jnp.int32, ph.shape, 1)
    next_v = jnp.logical_and(next_v, col < (T - 1))

    mask = jnp.logical_and(bnd_ref[...] > jnp.float32(0.1),
                           jnp.logical_and(is_v, next_v))
    mask_ref[...] = mask.astype(jnp.float32)


def compute_boundary_mask(ph_labels, boundaries, vowel_ids):
    B, T = ph_labels.shape
    ph = ph_labels.astype(jnp.int32)
    # tiny (B,T) int32 roll in glue; the wrap column is killed in-kernel.
    # TODO(synk): fold into the kernel with pltpu.roll once lane-rotate on
    # non-128-aligned T is verified; the saving is a few KB of HBM.
    ph_next = jnp.roll(ph, shift=-1, axis=1)
    bnd = boundaries.astype(jnp.float32)
    vid = vowel_ids.astype(jnp.int32)

    kernel = functools.partial(_mask_kernel, T=T)
    return pl.pallas_call(
        kernel,
        out_shape=jax.ShapeDtypeStruct((B, T), jnp.float32),
        in_specs=[
            pl.BlockSpec(memory_space=pltpu.MemorySpace.VMEM),   # ph
            pl.BlockSpec(memory_space=pltpu.MemorySpace.VMEM),   # ph_next
            pl.BlockSpec(memory_space=pltpu.MemorySpace.VMEM),   # boundaries
            pl.BlockSpec(memory_space=pltpu.MemorySpace.SMEM),   # vowel ids
        ],
        out_specs=pl.BlockSpec(memory_space=pltpu.MemorySpace.VMEM),
    )(ph, ph_next, bnd, vid)


# ----------------------------------------------------------------------------
# Kernel 2: tiled masked triplet-margin reduction
#   grid = (cores, tiles); each step streams TM flat rows of x (bf16),
#   rebuilds the positives in-kernel (pltpu.roll; TM % T == 0 so no cross-tile
#   row is needed), pairs each 8-row group with one pooled negative, and
#   accumulates a single masked scalar per core.
# ----------------------------------------------------------------------------
def _triplet_kernel(x_ref, neg_ref, m_ref, loss_ref, *, T, TM, R, margin):
    i = pl.program_id(1)

    @pl.when(i == 0)
    def _init():
        loss_ref[...] = jnp.zeros_like(loss_ref)

    D = x_ref.shape[-1]
    a = x_ref[...].astype(jnp.float32)                 # (TM, D) anchors

    # positive = previous frame; torch clamps t-1 at 0, so the first frame of
    # every utterance is its own positive.  TM % T == 0 => tile-local row % T
    # is exactly the time index, and the roll wrap (row 0 <- row TM-1) is
    # always overwritten by the t == 0 select.
    p = pltpu.roll(a, shift=1, axis=0)                 # XLU sublane rotate
    row = jax.lax.broadcasted_iota(jnp.int32, (TM, 1), 0)
    p = jnp.where(row % T == 0, a, p)

    a3 = a.reshape(R, 8, D)
    p3 = p.reshape(R, 8, D)
    n3 = neg_ref[...].astype(jnp.float32).reshape(R, 1, D)   # 1 negative / 8 rows

    eps = jnp.float32(1e-6)   # torch pairwise_distance adds eps inside the norm
    d_ap = jnp.sqrt(jnp.sum((a3 - p3 + eps) ** 2, axis=-1))  # (R, 8)
    d_an = jnp.sqrt(jnp.sum((a3 - n3 + eps) ** 2, axis=-1))  # (R, 8)
    per = jnp.maximum(d_ap - d_an + jnp.float32(margin), jnp.float32(0.0))

    # select (NOT multiply): padded / out-of-bounds rows may carry garbage.
    m = m_ref[...]                                            # (R, 8) {0,1}
    tile_sum = jnp.sum(jnp.where(m > 0.5, per, jnp.float32(0.0)))
    loss_ref[...] = loss_ref[...] + tile_sum.reshape(1, 1, 1)


def _num_tensorcores():
    """2 on megacore-style chips (2 TensorCores/chip), else 1."""
    try:
        kind = jax.devices()[0].device_kind.lower()
    except Exception:
        return 1
    if any(tag in kind for tag in ("v7", "7x", "v4", "v5p")):
        return 2
    return 1


def _derive_tiling(N, T, D, itemsize, cores,
                   target_step_bytes=4 * 1024 * 1024,
                   vmem_budget=24 * 1024 * 1024):
    # Tile rows: multiple of T (tiles start at utterance starts -> no cross-tile
    # previous row) and of 64 (so the (R, D)/(R, 8) side blocks stay 8-aligned).
    L = (64 * T) // math.gcd(64, T)
    # HBM bytes streamed per frame row (anchor + negative pool + mask)
    row_hbm = D * itemsize + (D * itemsize) // 8 + 4
    # double-buffered, lane-padded VMEM bytes per frame row
    lanes = -(-D // 128) * 128
    row_vmem = 2 * (lanes * itemsize + (lanes * itemsize) // 8 + 64)
    rows = min(max(target_step_bytes // row_hbm, L),
               max(vmem_budget // row_vmem, L))        # v7x: keep well under 64 MiB
    rows = min(rows, -(-N // L) * L)                   # no bigger than the problem
    TM = max(L, (rows // L) * L)
    R = TM // 8
    NT_raw = -(-N // TM)
    NT = -(-NT_raw // cores) * cores                   # both v7x TensorCores busy
    NTH = NT // cores
    N_pad = NT * TM
    vmem_limit = min(48 << 20, max(16 << 20, TM * row_vmem + (4 << 20)))
    return TM, R, NT_raw, NT, NTH, N_pad, vmem_limit


def _triplet_call(x_c, neg_pool, mask_grp, *, T, TM, R, NT_raw, NTH, cores,
                  margin, vmem_limit):
    N, D = x_c.shape
    last_blk = NT_raw - 1
    kernel = functools.partial(_triplet_kernel, T=T, TM=TM, R=R, margin=margin)

    in_specs = [
        # anchors: rows [g*TM, (g+1)*TM); clamp fully-padded tiles (mask == 0)
        pl.BlockSpec((TM, D), lambda c, i: (jnp.minimum(c * NTH + i, last_blk), 0)),
        # negative pool: one row per 8 anchor rows, same tiling
        pl.BlockSpec((R, D), lambda c, i: (c * NTH + i, 0)),
        # boundary mask, lane-packed as (N_pad/8, 8)
        pl.BlockSpec((R, 8), lambda c, i: (c * NTH + i, 0)),
    ]
    out_specs = pl.BlockSpec((1, 1, 1), lambda c, i: (c, 0, 0))
    out_shape = jax.ShapeDtypeStruct((cores, 1, 1), jnp.float32)

    return pl.pallas_call(
        kernel,
        grid=(cores, NTH),
        in_specs=in_specs,
        out_specs=out_specs,
        out_shape=out_shape,
        compiler_params=pltpu.CompilerParams(
            dimension_semantics=("parallel", "arbitrary"),
            vmem_limit_bytes=int(vmem_limit)),
    )(x_c, neg_pool, mask_grp)


# ----------------------------------------------------------------------------
# Full forward pass (glue in JAX, hot paths in Pallas)
# ----------------------------------------------------------------------------
def continuous_vowel_boundary_loss(frame_features, boundaries, ph_labels,
                                   vowel_ids, margin=0.3, *, key,
                                   compute_dtype=jnp.bfloat16, num_cores=None,
                                   target_tile_bytes=4 * 1024 * 1024):
    B, T, D = frame_features.shape
    N = B * T
    x_c = frame_features.reshape(N, D).astype(compute_dtype)

    # boundary mask (Pallas kernel, dense (B, T) layout)
    mask_flat = compute_boundary_mask(ph_labels, boundaries, vowel_ids).reshape(N)
    count = jnp.sum(mask_flat)

    cores = _num_tensorcores() if num_cores is None else max(1, int(num_cores))
    itemsize = jnp.dtype(compute_dtype).itemsize
    TM, R, NT_raw, NT, NTH, N_pad, vmem_limit = _derive_tiling(
        N, T, D, itemsize, cores, target_step_bytes=target_tile_bytes)

    # negative sampling: O(N) cumsum compaction of non-boundary frame indices,
    # then a SMALL gather of one non-boundary frame per 8-row group (marginally
    # identical to the reference's uniform non-boundary sampling).
    nonb = (mask_flat < 0.5).astype(jnp.int32)
    num_nonb = jnp.sum(nonb)
    rank = jnp.cumsum(nonb) - 1
    scatter_to = jnp.where(nonb > 0, rank, N)                  # boundary rows -> OOB
    compact = jnp.zeros((N,), jnp.int32).at[scatter_to].set(
        jnp.arange(N, dtype=jnp.int32), mode="drop")
    NG = N_pad // 8
    u = jax.random.uniform(key, (NG,), dtype=jnp.float32)
    r = jnp.floor(u * num_nonb.astype(jnp.float32)).astype(jnp.int32)
    r = jnp.clip(r, 0, jnp.maximum(num_nonb - 1, 0))
    neg_pool = x_c[compact[r]]                                 # (NG, D) compute dtype

    mask_grp = jnp.pad(mask_flat, (0, N_pad - N)).reshape(NG, 8)

    loss_parts = _triplet_call(
        x_c, neg_pool, mask_grp,
        T=T, TM=TM, R=R, NT_raw=NT_raw, NTH=NTH, cores=cores,
        margin=float(margin), vmem_limit=vmem_limit)
    loss_sum = jnp.sum(loss_parts)

    valid = jnp.logical_and(count > 0.0, num_nonb > 0)
    return jnp.where(valid, loss_sum / jnp.maximum(count, 1.0),
                     jnp.float32(1e-6))


if __name__ == "__main__":
    key = jax.random.PRNGKey(0)
    k1, k2, k3, k4 = jax.random.split(key, 4)

    B, T, D = 4, 16, 32
    vowel_vocab = {"a": 1, "e": 3, "i": 5, "o": 7, "u": 9}
    vowel_ids = jnp.asarray(list(vowel_vocab.values()), dtype=jnp.int32)

    frame_features = jax.random.normal(k1, (B, T, D), dtype=jnp.float32)
    boundaries = jax.random.uniform(k2, (B, T), dtype=jnp.float32)
    ph_labels = jax.random.randint(k3, (B, T), 0, 12, dtype=jnp.int32)

    loss = continuous_vowel_boundary_loss(
        frame_features, boundaries, ph_labels, vowel_ids, margin=0.3, key=k4)
    jax.block_until_ready(loss)
    print("KERNEL_OK")
</pallas_src>

<mosaic_0001>
module attributes {stable_mosaic.version = 11 : i64} {
  func.func @_mask_kernel(%arg0: memref<4x16xi32, #tpu.memory_space<vmem>>, %arg1: memref<4x16xi32, #tpu.memory_space<vmem>>, %arg2: memref<4x16xf32, #tpu.memory_space<vmem>>, %arg3: memref<5xi32, #tpu.memory_space<smem>>, %arg4: memref<4x16xf32, #tpu.memory_space<vmem>>) attributes {dimension_semantics = [], scalar_prefetch = 0 : i64, scratch_operands = 0 : i64, tpu.core_type = #tpu.core_type<tc>} {
    %c0 = arith.constant 0 : index
    %c0_0 = arith.constant 0 : index
    %0 = vector.load %arg0[%c0, %c0_0] : memref<4x16xi32, #tpu.memory_space<vmem>>, vector<4x16xi32>
    %c0_1 = arith.constant 0 : index
    %c0_2 = arith.constant 0 : index
    %1 = vector.load %arg1[%c0_1, %c0_2] : memref<4x16xi32, #tpu.memory_space<vmem>>, vector<4x16xi32>
    %false = arith.constant false
    %2 = vector.broadcast %false : i1 to vector<4x16xi1>
    %false_3 = arith.constant false
    %3 = vector.broadcast %false_3 : i1 to vector<4x16xi1>
    %c0_4 = arith.constant 0 : index
    %4 = memref.load %arg3[%c0_4] : memref<5xi32, #tpu.memory_space<smem>>
    %5 = vector.broadcast %4 : i32 to vector<4x16xi32>
    %6 = arith.cmpi eq, %0, %5 : vector<4x16xi32>
    %7 = arith.ori %2, %6 : vector<4x16xi1>
    %8 = vector.broadcast %4 : i32 to vector<4x16xi32>
    %9 = arith.cmpi eq, %1, %8 : vector<4x16xi32>
    %10 = arith.ori %3, %9 : vector<4x16xi1>
    %c1 = arith.constant 1 : index
    %11 = memref.load %arg3[%c1] : memref<5xi32, #tpu.memory_space<smem>>
    %12 = vector.broadcast %11 : i32 to vector<4x16xi32>
    %13 = arith.cmpi eq, %0, %12 : vector<4x16xi32>
    %14 = arith.ori %7, %13 : vector<4x16xi1>
    %15 = vector.broadcast %11 : i32 to vector<4x16xi32>
    %16 = arith.cmpi eq, %1, %15 : vector<4x16xi32>
    %17 = arith.ori %10, %16 : vector<4x16xi1>
    %c2 = arith.constant 2 : index
    %18 = memref.load %arg3[%c2] : memref<5xi32, #tpu.memory_space<smem>>
    %19 = vector.broadcast %18 : i32 to vector<4x16xi32>
    %20 = arith.cmpi eq, %0, %19 : vector<4x16xi32>
    %21 = arith.ori %14, %20 : vector<4x16xi1>
    %22 = vector.broadcast %18 : i32 to vector<4x16xi32>
    %23 = arith.cmpi eq, %1, %22 : vector<4x16xi32>
    %24 = arith.ori %17, %23 : vector<4x16xi1>
    %c3 = arith.constant 3 : index
    %25 = memref.load %arg3[%c3] : memref<5xi32, #tpu.memory_space<smem>>
    %26 = vector.broadcast %25 : i32 to vector<4x16xi32>
    %27 = arith.cmpi eq, %0, %26 : vector<4x16xi32>
    %28 = arith.ori %21, %27 : vector<4x16xi1>
    %29 = vector.broadcast %25 : i32 to vector<4x16xi32>
    %30 = arith.cmpi eq, %1, %29 : vector<4x16xi32>
    %31 = arith.ori %24, %30 : vector<4x16xi1>
    %c4 = arith.constant 4 : index
    %32 = memref.load %arg3[%c4] : memref<5xi32, #tpu.memory_space<smem>>
    %33 = vector.broadcast %32 : i32 to vector<4x16xi32>
    %34 = arith.cmpi eq, %0, %33 : vector<4x16xi32>
    %35 = arith.ori %28, %34 : vector<4x16xi1>
    %36 = vector.broadcast %32 : i32 to vector<4x16xi32>
    %37 = arith.cmpi eq, %1, %36 : vector<4x16xi32>
    %38 = arith.ori %31, %37 : vector<4x16xi1>
    %39 = tpu.iota {dimensions = array<i32: 1>} : vector<4x16xi32>
    %c15_i32 = arith.constant 15 : i32
    %40 = vector.broadcast %c15_i32 : i32 to vector<4x16xi32>
    %41 = arith.cmpi slt, %39, %40 : vector<4x16xi32>
    %42 = arith.andi %38, %41 : vector<4x16xi1>
    %c0_5 = arith.constant 0 : index
    %c0_6 = arith.constant 0 : index
    %43 = vector.load %arg2[%c0_5, %c0_6] : memref<4x16xf32, #tpu.memory_space<vmem>>, vector<4x16xf32>
    %cst = arith.constant 1.000000e-01 : f32
    %44 = vector.broadcast %cst : f32 to vector<4x16xf32>
    %45 = arith.cmpf ogt, %43, %44 : vector<4x16xf32>
    %46 = arith.andi %35, %42 : vector<4x16xi1>
    %47 = arith.andi %45, %46 : vector<4x16xi1>
    %48 = arith.extui %47 : vector<4x16xi1> to vector<4x16xi32>
    %49 = arith.sitofp %48 : vector<4x16xi32> to vector<4x16xf32>
    %c0_7 = arith.constant 0 : index
    %c0_8 = arith.constant 0 : index
    %50 = vector.load %arg4[%c0_7, %c0_8] : memref<4x16xf32, #tpu.memory_space<vmem>>, vector<4x16xf32>
    tpu.vector_store %arg4[%c0_7, %c0_8], %49 {strides = array<i32>} : memref<4x16xf32, #tpu.memory_space<vmem>>, vector<4x16xf32>,
    return
  }
}

</mosaic_0001>

<bundles_post_ra>
// kernel: tpu_custom_call.1
= control target key start
LH: loop header
LB: loop body
LE: loop exit
PB: predicated region body
PF: predicated region fallthrough
CT: control target
= control target key end

     0   :  { %9 = vsyncpa [#allocation3], 0  ;;  %s294_s0 = inlined_call_operand.hbm [shape: s32[4,16], index: 0, kind: input, shape index: {}]   ;;  %s295_s1 = inlined_call_operand.hbm [shape: s32[4,16], index: 1, kind: input, shape index: {}]   ;;  %s296_s2 = inlined_call_operand.vmem [shape: f32[4,16], index: 2, kind: input, shape index: {}]   ;;  %s297_s3 = inlined_call_operand.vmem [shape: s32[5], index: 3, kind: input, shape index: {}]   ;;  %s298_s4 = inlined_call_operand.hbm [shape: f32[4,16], index: 4, kind: output, shape index: {}]  }
   0x1   :  { %10 = vsyncpa [#allocation7], 0 }
   0x2   :  { %11 = vsyncpa [#allocation5], 0 }
   0x3   :  { %12 = vsyncpa [#allocation4], 0  ;;  %s210_s15 = smov [#allocation2]   ;;  %s211_s17 = smov [#allocation6]  }
   0x4   :  { %s19_s16 = sshll.u32 %s210_s15, 4  ;;  %s29_s18 = sshll.u32 %s211_s17, 4  ;;  %s20_s16 = int_to_ptr.vmem [resolvable:$true] %s19_s16  ;;  %s30_s18 = int_to_ptr.vmem [resolvable:$true] %s29_s18 }
   0x5   :  { %s124_s21 = scalar_lea.hbm %s294_s0, 64 }
   0x6   :  { %p125_p0 = scmp.ne.s32.totalorder %s294_s0, %s124_s21  ;;  %p128_p1 = scmp.lt.u32.totalorder %s124_s21, %s294_s0 }
   0x8   :  { %p130_p2 = pnand %p128_p1, %p125_p0 }
   0xa   :  { %133 = shalt.err (!%p130_p2)
}
   0xb   :  { %s134_s26 = scalar_lea.vmem %s20_s16, 64  ;;  %p139_p4 = scmp.lt.s32.totalorder %s20_s16, %s20_s16 }
   0xc   :  { %p135_p3 = scmp.ne.s32.totalorder %s20_s16, %s134_s26  ;;  %p140_p5 = scmp.lt.s32.totalorder %s134_s26, %s134_s26 }
   0xe   :  { %p141_p6 = por %p140_p5, %p139_p4 }
  0x10   :  { %p142_p7 = pnand %p141_p6, %p135_p3 }
  0x12   :  { %145 = shalt.err (!%p142_p7)
}
  0x13   :  { %22 = dma.hbm_to_vmem [thread:$0]  %s294_s0, 64, %s20_s16, [#allocation3]  }
  0x14   :  { %s146_s5 = scalar_lea.hbm %s295_s1, 64 }
  0x15   :  { %p147_p8 = scmp.ne.s32.totalorder %s295_s1, %s146_s5  ;;  %p150_p9 = scmp.lt.u32.totalorder %s146_s5, %s295_s1 }
  0x17   :  { %p152_p10 = pnand %p150_p9, %p147_p8 }
  0x19   :  { %155 = shalt.err (!%p152_p10)
}
  0x1a   :  { %s156_s10 = scalar_lea.vmem %s30_s18, 64  ;;  %p161_p12 = scmp.lt.s32.totalorder %s30_s18, %s30_s18 }
  0x1b   :  { %p157_p11 = scmp.ne.s32.totalorder %s30_s18, %s156_s10  ;;  %p162_p13 = scmp.lt.s32.totalorder %s156_s10, %s156_s10 }
  0x1d   :  { %p163_p0 = por %p162_p13, %p161_p12 }
  0x1f   :  { %p164_p1 = pnand %p163_p0, %p157_p11 }
  0x21   :  { %167 = shalt.err (!%p164_p1)
}
  0x22   :  { %32 = dma.hbm_to_vmem [thread:$0]  %s295_s1, 64, %s30_s18, [#allocation7]  }
  0x23   :  { %s41_s14 = sshll.u32 %s297_s3, 4  ;;  %s42_s14 = int_to_ptr.vmem [resolvable:$true] %s41_s14 }
  0x24   :  { %s168_s15 = scalar_lea.vmem %s42_s14, 16  ;;  %p173_p3 = scmp.lt.s32.totalorder %s42_s14, %s42_s14 }
  0x25   :  { %p169_p2 = scmp.ne.s32.totalorder %s42_s14, %s168_s15  ;;  %p174_p4 = scmp.lt.s32.totalorder %s168_s15, %s168_s15 }
  0x27   :  { %p175_p5 = por %p174_p4, %p173_p3 }
  0x29   :  { %p176_p6 = pnand %p175_p5, %p169_p2 }
  0x2b   :  { %179 = shalt.err (!%p176_p6)
}
  0x2c   :  { %s212_s16 = smov [#allocation8]  }
  0x2d   :  { %44 = dma.vmem_to_smem %s42_s14, 16, %s212_s16, [#allocation5]  }
  0x2e   :  { %202 = dma.done.wait [#allocation3], 64  }
  0x2f   :  { %203 = vsyncadd [#allocation3], 4294967232 }
  0x30   :  { %204 = dma.done.wait [#allocation7], 64  }
  0x31   :  { %205 = vsyncadd [#allocation7], 4294967232 }
  0x32   :  { %206 = dma.done.wait [#allocation5], 16  }
  0x33   :  { %207 = vsyncadd [#allocation5], 4294967280 }
  0x34   :  { %54 = sfence }
  0x35   :  { %s57_s1 = sld [smem:[#allocation8]]  ;;  %s114_s17 = sld [smem:[#allocation8 + $0x1]]  ;;  %v55_v0 = vld [vmem:[#allocation2] sm:$0xf]  ;;  %v56_v1 = vld [vmem:[#allocation6] sm:$0xf]  ;;  %v85_v3 = vlaneseq }
  0x36   :  { %s115_s3 = sld [smem:[#allocation8 + $0x2]]  ;;  %s116_s18 = sld [smem:[#allocation8 + $0x3]]  ;;  %v89_v11 = vld [vmem:[%s296_s2] sm:$0xf]  ;;  %v214_v12 = vmov 0.0  }
  0x37   :  { %s117_s19 = sld [smem:[#allocation8 + $0x4]]  ;;  %v86_v10 = vand.u32 127, %v85_v3  ;;  %s213_s22 = smov [#allocation9]  }
  0x38   :  { %s103_s23 = sshll.u32 %s213_s22, 4  ;;  %s104_s23 = int_to_ptr.vmem [resolvable:$true] %s103_s23 }
  0x39   :  { %s180_s24 = scalar_lea.vmem %s104_s23, 64  ;;  %p185_p8 = scmp.lt.s32.totalorder %s104_s23, %s104_s23 }
  0x3a   :  { %p181_p7 = scmp.ne.s32.totalorder %s104_s23, %s180_s24  ;;  %p186_p9 = scmp.lt.s32.totalorder %s180_s24, %s180_s24 }
  0x3b   :  { %v58_v2 = vstv %s57_s1  ;;  %v62_v6 = vstv %s114_s17 }
  0x3c   :  { %vm267_vm0 = vcmp.eq.s32.totalorder %v55_v0, %v58_v2  ;;  %vm271_vm1 = vcmp.eq.s32.totalorder %v56_v1, %v58_v2  ;;  %v68_v7 = vstv %s115_s3  ;;  %vm63_vm2 = vcmp.eq.s32.totalorder %v55_v0, %v62_v6  ;;  %p187_p10 = por %p186_p9, %p185_p8 }
  0x3d   :  { %vm65_vm3 = vcmp.eq.s32.totalorder %v56_v1, %v62_v6  ;;  %vm69_vm4 = vcmp.eq.s32.totalorder %v55_v0, %v68_v7  ;;  %vm64_vm5 = vmor %vm267_vm0, %vm63_vm2  ;;  %vm71_vm6 = vcmp.eq.s32.totalorder %v56_v1, %v68_v7  ;;  %v74_v8 = vstv %s116_s18 }
  0x3e   :  { %v80_v9 = vstv %s117_s19  ;;  %vm66_vm7 = vmor %vm271_vm1, %vm65_vm3  ;;  %vm75_vm8 = vcmp.eq.s32.totalorder %v55_v0, %v74_v8  ;;  %vm77_vm10 = vcmp.eq.s32.totalorder %v56_v1, %v74_v8  ;;  %vm87_vm0 = vcmp.lt.s32.totalorder %v86_v10, 15  ;;  %p188_p11 = pnand %p187_p10, %p181_p7 }
  0x3f   :  { %vm70_vm9 = vmor %vm64_vm5, %vm69_vm4  ;;  %vm81_vm12 = vcmp.eq.s32.totalorder %v55_v0, %v80_v9  ;;  %vm83_vm14 = vcmp.eq.s32.totalorder %v56_v1, %v80_v9  ;;  %vm90_vm3 = vcmp.gt.f32.partialorder %v89_v11, 0.1 }
  0x40   :  { %vm72_vm11 = vmor %vm66_vm7, %vm71_vm6  ;;  %vm95_vm6 = vcmask 125952  }
  0x41   :  { %vm76_vm13 = vmor %vm70_vm9, %vm75_vm8 }
  0x42   :  { %vm78_vm15 = vmor %vm72_vm11, %vm77_vm10 }
  0x43   :  { %vm82_vm2 = vmor %vm76_vm13, %vm81_vm12 }
  0x44   :  { %vm84_vm1 = vmor %vm78_vm15, %vm83_vm14 }
  0x45   :  { %vm88_vm4 = vmand %vm84_vm1, %vm87_vm0 }
  0x46   :  { %vm91_vm5 = vmand %vm82_vm2, %vm88_vm4 }
  0x47   :  { %vm92_vm7 = vmand %vm90_vm3, %vm91_vm5 }
  0x48   :  { %v118_v13 = vsel %vm92_vm7, 1.0, %v214_v12 }
  0x49   :  { %96 = vst.msk [vmem:[#allocation9] sm:$0xf] %vm95_vm6, %v118_v13 }
  0x4a   :  { %191 = shalt.err (!%p188_p11)
}
  0x4b   :  { %s192_s26 = scalar_lea.hbm %s298_s4, 64 }
  0x4c   :  { %p193_p12 = scmp.ne.s32.totalorder %s298_s4, %s192_s26  ;;  %p196_p13 = scmp.lt.u32.totalorder %s192_s26, %s298_s4 }
  0x4e   :  { %p198_p0 = pnand %p196_p13, %p193_p12 }
  0x50   :  { %201 = shalt.err (!%p198_p0)
}
  0x51   :  { %106 = dma.vmem_to_hbm [thread:$0]  %s104_s23, 64, %s298_s4, [#allocation4]  }
  0x52   :  { %208 = dma.done.wait [#allocation4], 64  }
  0x53   :  { %209 = vsyncadd [#allocation4], 4294967232 }
  0x54   :  { %110 = vsyncpa [#allocation3], 1 }
  0x55   :  { %111 = vsyncpa [#allocation7], 1 }
  0x56   :  { %112 = vsyncpa [#allocation4], 1 }
  0x57   :  { %113 = vsyncpa [#allocation5], 1 }

</bundles_post_ra>
